<compile_context>
chip_gen: v6e
topology: v6e:2x2x1
jax: 0.10.0
libtpu: 0.0.40
codegen_flags: <defaults>
</compile_context>

<pallas_src>
import functools

import jax
import jax.numpy as jnp
from jax.experimental import pallas as pl
from jax.experimental.pallas import tpu as pltpu

TARGETS_RNC = 4
CONDS_RNC = 6
IN_DIM = TARGETS_RNC + CONDS_RNC   # 10
HID_DIM = 128
OUT_DIM = TARGETS_RNC              # 4


def _round_up(n, m):
    return ((n + m - 1) // m) * m


def _mlp_kernel(x_ref, w1_ref, b1_ref, w2_ref, b2_ref, w3_ref, b3_ref, o_ref):
    # x_ref:  (TB, IN_DIM)       f32
    # w1_ref: (IN_DIM, HID_DIM)  f32    b1_ref: (1, HID_DIM)  f32
    # w2_ref: (HID_DIM, HID_DIM) f32    b2_ref: (1, HID_DIM)  f32
    # w3_ref: (HID_DIM, OUT_DIM) f32    b3_ref: (1, OUT_DIM)  f32
    # o_ref:  (TB, OUT_DIM)      f32
    x = x_ref[...]

    h1 = jnp.dot(x, w1_ref[...], preferred_element_type=jnp.float32) + b1_ref[...]
    h1 = jnp.maximum(h1, 0.0)

    h2 = jnp.dot(h1, w2_ref[...], preferred_element_type=jnp.float32) + b2_ref[...]
    h2 = jnp.maximum(h2, 0.0)

    out = jnp.dot(h2, w3_ref[...], preferred_element_type=jnp.float32) + b3_ref[...]
    o_ref[...] = out.astype(o_ref.dtype)


@functools.partial(jax.jit, static_argnames=("tile_b",))
def generator_rnc_forward(x, params, *, tile_b=2048):
    """Forward pass of Generator_rnc.  x: [B, 10] f32 -> [B, 4] f32."""
    B, F = x.shape
    assert F == IN_DIM

    # --- tile / padding selection (all static at trace time) ----------------
    tile_b = max(128, _round_up(int(tile_b), 128))
    tile_b_eff = min(tile_b, _round_up(B, 128))       # don't over-pad tiny B
    if B >= 256:
        # Guarantee >= 2 grid steps so both v7x TensorCores get work.
        half = max(128, _round_up(-(-B // 2), 128))
        tile_b_eff = min(tile_b_eff, half)
    b_pad = _round_up(B, tile_b_eff)
    grid = (b_pad // tile_b_eff,)

    x_p = x.astype(jnp.float32)
    if b_pad != B:
        x_p = jnp.pad(x_p, ((0, b_pad - B), (0, 0)))

    # --- parameters (all f32; matches the PyTorch module's numerics) --------
    w1 = params["w1"].astype(jnp.float32)                       # (IN, HID)
    b1 = params["b1"].reshape(1, HID_DIM).astype(jnp.float32)
    w2 = params["w2"].astype(jnp.float32)                       # (HID, HID)
    b2 = params["b2"].reshape(1, HID_DIM).astype(jnp.float32)
    w3 = params["w3"].astype(jnp.float32)                       # (HID, OUT)
    b3 = params["b3"].reshape(1, OUT_DIM).astype(jnp.float32)

    # Grid-invariant (VMEM-resident) blocks for all weights / biases:
    # index_map -> (0, 0) every step, so they are fetched from HBM once.
    rep = lambda shape: pl.BlockSpec(shape, lambda i: (0, 0))

    flops = 2 * b_pad * (IN_DIM * HID_DIM + HID_DIM * HID_DIM + HID_DIM * OUT_DIM)
    bytes_accessed = (
        b_pad * IN_DIM * 4 + b_pad * OUT_DIM * 4
        + (IN_DIM * HID_DIM + HID_DIM * HID_DIM + HID_DIM * OUT_DIM) * 4
        + (2 * HID_DIM + OUT_DIM) * 4
    )

    out = pl.pallas_call(
        _mlp_kernel,
        out_shape=jax.ShapeDtypeStruct((b_pad, OUT_DIM), jnp.float32),
        grid_spec=pltpu.PrefetchScalarGridSpec(
            num_scalar_prefetch=0,
            grid=grid,
            in_specs=[
                pl.BlockSpec((tile_b_eff, IN_DIM), lambda i: (i, 0)),  # x tile
                rep((IN_DIM, HID_DIM)),    # w1
                rep((1, HID_DIM)),         # b1
                rep((HID_DIM, HID_DIM)),   # w2
                rep((1, HID_DIM)),         # b2
                rep((HID_DIM, OUT_DIM)),   # w3
                rep((1, OUT_DIM)),         # b3
            ],
            out_specs=pl.BlockSpec((tile_b_eff, OUT_DIM), lambda i: (i, 0)),
        ),
        compiler_params=pltpu.CompilerParams(
            dimension_semantics=("parallel",),
        ),
        cost_estimate=pl.CostEstimate(
            flops=flops, transcendentals=0, bytes_accessed=bytes_accessed),
    )(x_p, w1, b1, w2, b2, w3, b3)

    # Drop the batch padding (cheap XLA slice).
    return out[:B]                                               # (B, OUT_DIM)


def init_params(key):
    """PyTorch nn.Linear default init (uniform +-1/sqrt(fan_in)), stored as
    [fan_in, fan_out] so the kernel computes x @ W directly."""
    k1, k2, k3, k4, k5, k6 = jax.random.split(key, 6)

    def lin(kw, kb, fan_in, fan_out):
        bound = 1.0 / jnp.sqrt(float(fan_in))
        w = jax.random.uniform(kw, (fan_in, fan_out), jnp.float32, -bound, bound)
        b = jax.random.uniform(kb, (fan_out,), jnp.float32, -bound, bound)
        return w, b

    w1, b1 = lin(k1, k2, IN_DIM, HID_DIM)
    w2, b2 = lin(k3, k4, HID_DIM, HID_DIM)
    w3, b3 = lin(k5, k6, HID_DIM, OUT_DIM)
    return {"w1": w1, "b1": b1, "w2": w2, "b2": b2, "w3": w3, "b3": b3}


def _reference_forward(x, p):
    """Pure-JAX f32 reference (same math as the PyTorch module)."""
    h1 = jnp.maximum(
        jnp.dot(x, p["w1"], preferred_element_type=jnp.float32) + p["b1"], 0.0)
    h2 = jnp.maximum(
        jnp.dot(h1, p["w2"], preferred_element_type=jnp.float32) + p["b2"], 0.0)
    return jnp.dot(h2, p["w3"], preferred_element_type=jnp.float32) + p["b3"]


if __name__ == "__main__":
    key = jax.random.PRNGKey(0)
    kx, kp = jax.random.split(key)
    params = init_params(kp)

    # Small batch (single grid step, padded) and a batch that exercises
    # padding + a multi-step ("parallel") grid.
    for B in (8, 300):
        x = jax.random.normal(jax.random.fold_in(kx, B), (B, IN_DIM), jnp.float32)
        out = jax.block_until_ready(generator_rnc_forward(x, params))
        assert out.shape == (B, OUT_DIM)
        ref = _reference_forward(x, params)
        assert jnp.allclose(out, ref, atol=2e-2, rtol=2e-2), float(
            jnp.max(jnp.abs(out - ref)))

    print("KERNEL_OK")
</pallas_src>

<mosaic_0001>
module attributes {stable_mosaic.version = 11 : i64} {
  func.func @_mlp_kernel(%arg0: i32, %arg1: memref<128x10xf32, #tpu.memory_space<vmem>>, %arg2: memref<10x128xf32, #tpu.memory_space<vmem>>, %arg3: memref<1x128xf32, #tpu.memory_space<vmem>>, %arg4: memref<128x128xf32, #tpu.memory_space<vmem>>, %arg5: memref<1x128xf32, #tpu.memory_space<vmem>>, %arg6: memref<128x4xf32, #tpu.memory_space<vmem>>, %arg7: memref<1x4xf32, #tpu.memory_space<vmem>>, %arg8: memref<128x4xf32, #tpu.memory_space<vmem>>) attributes {dimension_semantics = [#tpu.dimension_semantics<parallel>], iteration_bounds = array<i64: 1>, scalar_prefetch = 0 : i64, scratch_operands = 0 : i64, tpu.core_type = #tpu.core_type<tc>, window_params = [{transform_indices = @transform_0, window_bounds = array<i64: 128, 10>}, {pipeline_mode = #tpu.pipeline_mode<synchronous>, transform_indices = @transform_1, window_bounds = array<i64: 10, 128>}, {pipeline_mode = #tpu.pipeline_mode<synchronous>, transform_indices = @transform_2, window_bounds = array<i64: 1, 128>}, {pipeline_mode = #tpu.pipeline_mode<synchronous>, transform_indices = @transform_3, window_bounds = array<i64: 128, 128>}, {pipeline_mode = #tpu.pipeline_mode<synchronous>, transform_indices = @transform_4, window_bounds = array<i64: 1, 128>}, {pipeline_mode = #tpu.pipeline_mode<synchronous>, transform_indices = @transform_5, window_bounds = array<i64: 128, 4>}, {pipeline_mode = #tpu.pipeline_mode<synchronous>, transform_indices = @transform_6, window_bounds = array<i64: 1, 4>}, {transform_indices = @transform_7, window_bounds = array<i64: 128, 4>}]} {
    %c0 = arith.constant 0 : index
    %c0_0 = arith.constant 0 : index
    %0 = vector.load %arg1[%c0, %c0_0] : memref<128x10xf32, #tpu.memory_space<vmem>>, vector<128x10xf32>
    %c0_1 = arith.constant 0 : index
    %c0_2 = arith.constant 0 : index
    %1 = vector.load %arg2[%c0_1, %c0_2] : memref<10x128xf32, #tpu.memory_space<vmem>>, vector<10x128xf32>
    %cst = arith.constant dense<0.000000e+00> : vector<128x128xf32>
    %2 = tpu.matmul %0, %1, %cst {dimension_numbers = #tpu.dot_dimension_numbers<[1], [0], [0], [1], [0, 0, 1, 1], [], []>} : vector<128x10xf32>, vector<10x128xf32>, vector<128x128xf32> -> vector<128x128xf32>
    %c0_3 = arith.constant 0 : index
    %c0_4 = arith.constant 0 : index
    %3 = vector.load %arg3[%c0_3, %c0_4] : memref<1x128xf32, #tpu.memory_space<vmem>>, vector<1x128xf32>
    %4 = vector.broadcast %3 : vector<1x128xf32> to vector<128x128xf32>
    %5 = arith.addf %2, %4 : vector<128x128xf32>
    %cst_5 = arith.constant 0.000000e+00 : f32
    %6 = vector.broadcast %cst_5 : f32 to vector<128x128xf32>
    %7 = arith.maximumf %5, %6 : vector<128x128xf32>
    %c0_6 = arith.constant 0 : index
    %c0_7 = arith.constant 0 : index
    %8 = vector.load %arg4[%c0_6, %c0_7] : memref<128x128xf32, #tpu.memory_space<vmem>>, vector<128x128xf32>
    %cst_8 = arith.constant dense<0.000000e+00> : vector<128x128xf32>
    %9 = tpu.matmul %7, %8, %cst_8 {dimension_numbers = #tpu.dot_dimension_numbers<[1], [0], [0], [1], [0, 0, 1, 1], [], []>} : vector<128x128xf32>, vector<128x128xf32>, vector<128x128xf32> -> vector<128x128xf32>
    %c0_9 = arith.constant 0 : index
    %c0_10 = arith.constant 0 : index
    %10 = vector.load %arg5[%c0_9, %c0_10] : memref<1x128xf32, #tpu.memory_space<vmem>>, vector<1x128xf32>
    %11 = vector.broadcast %10 : vector<1x128xf32> to vector<128x128xf32>
    %12 = arith.addf %9, %11 : vector<128x128xf32>
    %cst_11 = arith.constant 0.000000e+00 : f32
    %13 = vector.broadcast %cst_11 : f32 to vector<128x128xf32>
    %14 = arith.maximumf %12, %13 : vector<128x128xf32>
    %c0_12 = arith.constant 0 : index
    %c0_13 = arith.constant 0 : index
    %15 = vector.load %arg6[%c0_12, %c0_13] : memref<128x4xf32, #tpu.memory_space<vmem>>, vector<128x4xf32>
    %cst_14 = arith.constant dense<0.000000e+00> : vector<128x4xf32>
    %16 = tpu.matmul %14, %15, %cst_14 {dimension_numbers = #tpu.dot_dimension_numbers<[1], [0], [0], [1], [0, 0, 1, 1], [], []>} : vector<128x128xf32>, vector<128x4xf32>, vector<128x4xf32> -> vector<128x4xf32>
    %c0_15 = arith.constant 0 : index
    %c0_16 = arith.constant 0 : index
    %17 = vector.load %arg7[%c0_15, %c0_16] : memref<1x4xf32, #tpu.memory_space<vmem>>, vector<1x4xf32>
    %18 = vector.broadcast %17 : vector<1x4xf32> to vector<128x4xf32>
    %19 = arith.addf %16, %18 : vector<128x4xf32>
    %c0_17 = arith.constant 0 : index
    %c0_18 = arith.constant 0 : index
    %20 = vector.load %arg8[%c0_17, %c0_18] : memref<128x4xf32, #tpu.memory_space<vmem>>, vector<128x4xf32>
    tpu.vector_store %arg8[%c0_17, %c0_18], %19 {strides = array<i32>} : memref<128x4xf32, #tpu.memory_space<vmem>>, vector<128x4xf32>,
    return
  }
  func.func @transform_0(%arg0: i32) -> (i32, i32) {
    %c0_i32 = arith.constant 0 : i32
    %c0_i32_0 = arith.constant 0 : i32
    return %arg0, %c0_i32 : i32, i32
  }
  func.func @transform_1(%arg0: i32) -> (i32, i32) {
    %c0_i32 = arith.constant 0 : i32
    %c0_i32_0 = arith.constant 0 : i32
    %c0_i32_1 = arith.constant 0 : i32
    return %c0_i32, %c0_i32_0 : i32, i32
  }
  func.func @transform_2(%arg0: i32) -> (i32, i32) {
    %c0_i32 = arith.constant 0 : i32
    %c0_i32_0 = arith.constant 0 : i32
    %c0_i32_1 = arith.constant 0 : i32
    return %c0_i32, %c0_i32_0 : i32, i32
  }
  func.func @transform_3(%arg0: i32) -> (i32, i32) {
    %c0_i32 = arith.constant 0 : i32
    %c0_i32_0 = arith.constant 0 : i32
    %c0_i32_1 = arith.constant 0 : i32
    return %c0_i32, %c0_i32_0 : i32, i32
  }
  func.func @transform_4(%arg0: i32) -> (i32, i32) {
    %c0_i32 = arith.constant 0 : i32
    %c0_i32_0 = arith.constant 0 : i32
    %c0_i32_1 = arith.constant 0 : i32
    return %c0_i32, %c0_i32_0 : i32, i32
  }
  func.func @transform_5(%arg0: i32) -> (i32, i32) {
    %c0_i32 = arith.constant 0 : i32
    %c0_i32_0 = arith.constant 0 : i32
    %c0_i32_1 = arith.constant 0 : i32
    return %c0_i32, %c0_i32_0 : i32, i32
  }
  func.func @transform_6(%arg0: i32) -> (i32, i32) {
    %c0_i32 = arith.constant 0 : i32
    %c0_i32_0 = arith.constant 0 : i32
    %c0_i32_1 = arith.constant 0 : i32
    return %c0_i32, %c0_i32_0 : i32, i32
  }
  func.func @transform_7(%arg0: i32) -> (i32, i32) {
    %c0_i32 = arith.constant 0 : i32
    %c0_i32_0 = arith.constant 0 : i32
    return %arg0, %c0_i32 : i32, i32
  }
}

</mosaic_0001>

<bundles_post_ra>
// kernel: generator_rnc_forward.1
= control target key start
LH: loop header
LB: loop body
LE: loop exit
PB: predicated region body
PF: predicated region fallthrough
CT: control target
= control target key end

     0   :  { %vm100_vm0 = vcmask 1041408   ;;  %vm51_vm1 = vcmask 80896   ;;  %vm617_vm2 = vcmask 31744   ;;  %s1159_s1 = inlined_call_operand.vmem [shape: f32[10,128], index: 1, kind: input, shape index: {}]   ;;  %s1160_s0 = inlined_call_operand.vmem [shape: f32[128,10], index: 0, kind: input, shape index: {}]   ;;  %s1161_s3 = inlined_call_operand.vmem [shape: f32[128,128], index: 3, kind: input, shape index: {}]   ;;  %s1162_s5 = inlined_call_operand.vmem [shape: f32[128,4], index: 5, kind: input, shape index: {}]   ;;  %s1163_s2 = inlined_call_operand.vmem [shape: f32[1,128], index: 2, kind: input, shape index: {}]   ;;  %s1164_s4 = inlined_call_operand.vmem [shape: f32[1,128], index: 4, kind: input, shape index: {}]   ;;  %s1165_s6 = inlined_call_operand.vmem [shape: f32[1,4], index: 6, kind: input, shape index: {}]   ;;  %s1166_s7 = inlined_call_operand.vmem [shape: f32[128,4], index: 7, kind: output, shape index: {}]  }
   0x1   :  { %v43_v0 = vld [vmem:[%s1159_s1 + $0x8] sm:$0x3]  ;;  %v42_v1 = vld [vmem:[%s1159_s1] sm:$0xff]  ;;  %v28_v4 = vld [vmem:[%s1160_s0 + $0x10] sm:$0xff] }
   0x2   :  { %v26_v2 = vld [vmem:[%s1160_s0] sm:$0xff]  ;;  %740 = vmatprep.subr.msk.mxu0 %vm100_vm0, %v43_v0  ;;  %v27_v3 = vld [vmem:[%s1160_s0 + $0x8] sm:$0xff]  ;;  %v29_v5 = vld [vmem:[%s1160_s0 + $0x18] sm:$0xff] }
   0x3   :  { %744 = vmatprep.mubr.msk.f32.mxu0 %vm51_vm1, %v26_v2  ;;  %741 = vmatpush3.msk.msra.mxu0 %vm100_vm0, %v43_v0  ;;  %v280_v6 = vld [vmem:[%s1161_s3 + $0x78] sm:$0xff]  ;;  %v279_v7 = vld [vmem:[%s1161_s3 + $0x70] sm:$0xff]  ;;  %v30_v8 = vld [vmem:[%s1160_s0 + $0x20] sm:$0xff] }
   0x4   :  { %742 = vmatprep.subr.mxu0 %v42_v1  ;;  %768 = vmatprep.subr.mxu1 %v280_v6  ;;  %v278_v9 = vld [vmem:[%s1161_s3 + $0x68] sm:$0xff]  ;;  %v277_v11 = vld [vmem:[%s1161_s3 + $0x60] sm:$0xff]  ;;  %v32_v12 = vld [vmem:[%s1160_s0 + $0x30] sm:$0xff] }
   0x5   :  { %743 = vmatpush3.msra.mxu0 %v42_v1  ;;  %769 = vmatpush3.msra.mxu1 %v280_v6  ;;  %v31_v10 = vld [vmem:[%s1160_s0 + $0x28] sm:$0xff]  ;;  %v276_v13 = vld [vmem:[%s1161_s3 + $0x58] sm:$0xff]  ;;  %v275_v15 = vld [vmem:[%s1161_s3 + $0x50] sm:$0xff] }
   0x6   :  { %745 = vmatmul.mubr.msk.f32.vlgmr.msra.gmra.mxu0 %vm51_vm1, %v27_v3  ;;  %770 = vmatprep.subr.mxu1 %v279_v7  ;;  %v33_v14 = vld [vmem:[%s1160_s0 + $0x38] sm:$0xff]  ;;  %v34_v16 = vld [vmem:[%s1160_s0 + $0x40] sm:$0xff]  ;;  %v274_v17 = vld [vmem:[%s1161_s3 + $0x48] sm:$0xff] }
   0x7   :  { %747 = vmatprep.mubr.msk.f32.mxu0 %vm51_vm1, %v28_v4  ;;  %771 = vmatpush3.msra.mxu1 %v279_v7  ;;  %v35_v18 = vld [vmem:[%s1160_s0 + $0x48] sm:$0xff]  ;;  %v273_v19 = vld [vmem:[%s1161_s3 + $0x40] sm:$0xff]  ;;  %v36_v20 = vld [vmem:[%s1160_s0 + $0x50] sm:$0xff] }
   0x8   :  { %772 = vmatprep.subr.mxu1 %v278_v9  ;;  %v272_v21 = vld [vmem:[%s1161_s3 + $0x38] sm:$0xff]  ;;  %v271_v23 = vld [vmem:[%s1161_s3 + $0x30] sm:$0xff]  ;;  %v38_v24 = vld [vmem:[%s1160_s0 + $0x60] sm:$0xff] }
   0x9   :  { %773 = vmatpush3.msra.mxu1 %v278_v9  ;;  %v37_v22 = vld [vmem:[%s1160_s0 + $0x58] sm:$0xff]  ;;  %v270_v25 = vld [vmem:[%s1161_s3 + $0x28] sm:$0xff]  ;;  %v269_v27 = vld [vmem:[%s1161_s3 + $0x20] sm:$0xff] }
   0xa   :  { %748 = vmatmul.mubr.msk.f32.gmra.mxu0 %vm51_vm1, %v29_v5  ;;  %774 = vmatprep.subr.mxu1 %v277_v11  ;;  %v39_v26 = vld [vmem:[%s1160_s0 + $0x68] sm:$0xff]  ;;  %v40_v28 = vld [vmem:[%s1160_s0 + $0x70] sm:$0xff]  ;;  %v41_v29 = vld [vmem:[%s1160_s0 + $0x78] sm:$0xff] }
   0xb   :  { %750 = vmatprep.mubr.msk.f32.mxu0 %vm51_vm1, %v30_v8  ;;  %775 = vmatpush3.msra.mxu1 %v277_v11  ;;  %v268_v30 = vld [vmem:[%s1161_s3 + $0x18] sm:$0xff]  ;;  %v267_v31 = vld [vmem:[%s1161_s3 + $0x10] sm:$0xff]  ;;  %v266_v32 = vld [vmem:[%s1161_s3 + $0x8] sm:$0xff] }
   0xc   :  { %776 = vmatprep.subr.mxu1 %v276_v13  ;;  %v265_v33 = vld [vmem:[%s1161_s3] sm:$0xff]  ;;  %v464_v34 = vld [vmem:[%s1162_s5 + $0x78] sm:$0xff]  ;;  %v463_v35 = vld [vmem:[%s1162_s5 + $0x70] sm:$0xff] }
   0xd   :  { %777 = vmatpush3.msra.mxu1 %v276_v13  ;;  %824 = vmatprep.subr.mxu0 %v464_v34  ;;  %v462_v36 = vld [vmem:[%s1162_s5 + $0x68] sm:$0xff]  ;;  %v461_v37 = vld [vmem:[%s1162_s5 + $0x60] sm:$0xff]  ;;  %v460_v38 = vld [vmem:[%s1162_s5 + $0x58] sm:$0xff] }
   0xe   :  { %751 = vmatmul.mubr.msk.f32.gmra.mxu0 %vm51_vm1, %v31_v10  ;;  %778 = vmatprep.subr.mxu1 %v275_v15  ;;  %v459_v39 = vld [vmem:[%s1162_s5 + $0x50] sm:$0xff]  ;;  %v458_v40 = vld [vmem:[%s1162_s5 + $0x48] sm:$0xff]  ;;  %v457_v41 = vld [vmem:[%s1162_s5 + $0x40] sm:$0xff] }
   0xf   :  { %753 = vmatprep.mubr.msk.f32.mxu0 %vm51_vm1, %v32_v12  ;;  %779 = vmatpush3.msra.mxu1 %v275_v15  ;;  %v456_v42 = vld [vmem:[%s1162_s5 + $0x38] sm:$0xff]  ;;  %v455_v43 = vld [vmem:[%s1162_s5 + $0x30] sm:$0xff]  ;;  %v454_v44 = vld [vmem:[%s1162_s5 + $0x28] sm:$0xff] }
  0x10   :  { %780 = vmatprep.subr.mxu1 %v274_v17  ;;  %825 = vmatpush3.msra.mxu0 %v464_v34  ;;  %v453_v45 = vld [vmem:[%s1162_s5 + $0x20] sm:$0xff]  ;;  %v452_v46 = vld [vmem:[%s1162_s5 + $0x18] sm:$0xff] }
  0x11   :  { %781 = vmatpush3.msra.mxu1 %v274_v17  ;;  %826 = vmatprep.subr.mxu0 %v463_v35  ;;  %v638_v47 = vld [vmem:[%s1163_s2] ss:$0 sm:$0xff] }
  0x12   :  { %754 = vmatmul.mubr.msk.f32.gmra.mxu0 %vm51_vm1, %v33_v14  ;;  %782 = vmatprep.subr.mxu1 %v273_v19  ;;  %v449_v34 = vld [vmem:[%s1162_s5] sm:$0xff] }
  0x13   :  { %756 = vmatprep.mubr.msk.f32.mxu0 %vm51_vm1, %v34_v16  ;;  %783 = vmatpush3.msra.mxu1 %v273_v19 }
  0x14   :  { %784 = vmatprep.subr.mxu1 %v272_v21  ;;  %827 = vmatpush3.msra.mxu0 %v463_v35  ;;  %v656_v35 = vld [vmem:[%s1164_s4] ss:$0 sm:$0xff] }
  0x15   :  { %785 = vmatpush3.msra.mxu1 %v272_v21  ;;  %828 = vmatprep.subr.mxu0 %v462_v36 }
  0x16   :  { %757 = vmatmul.mubr.msk.f32.gmra.mxu0 %vm51_vm1, %v35_v18  ;;  %786 = vmatprep.subr.mxu1 %v271_v23 }
  0x17   :  { %759 = vmatprep.mubr.msk.f32.mxu0 %vm51_vm1, %v36_v20  ;;  %787 = vmatpush3.msra.mxu1 %v271_v23 }
  0x18   :  { %788 = vmatprep.subr.mxu1 %v270_v25  ;;  %829 = vmatpush3.msra.mxu0 %v462_v36 }
  0x19   :  { %789 = vmatpush3.msra.mxu1 %v270_v25  ;;  %830 = vmatprep.subr.mxu0 %v461_v37 }
  0x1a   :  { %760 = vmatmul.mubr.msk.f32.gmra.mxu0 %vm51_vm1, %v37_v22  ;;  %790 = vmatprep.subr.mxu1 %v269_v27 }
  0x1b   :  { %762 = vmatprep.mubr.msk.f32.mxu0 %vm51_vm1, %v38_v24  ;;  %791 = vmatpush3.msra.mxu1 %v269_v27 }
  0x1c   :  { %792 = vmatprep.subr.mxu1 %v268_v30  ;;  %831 = vmatpush3.msra.mxu0 %v461_v37 }
  0x1d   :  { %793 = vmatpush3.msra.mxu1 %v268_v30  ;;  %832 = vmatprep.subr.mxu0 %v460_v38 }
  0x1e   :  { %763 = vmatmul.mubr.msk.f32.gmra.mxu0 %vm51_vm1, %v39_v26  ;;  %794 = vmatprep.subr.mxu1 %v267_v31 }
  0x1f   :  { %765 = vmatprep.mubr.msk.f32.mxu0 %vm51_vm1, %v40_v28  ;;  %795 = vmatpush3.msra.mxu1 %v267_v31 }
  0x20   :  { %796 = vmatprep.subr.mxu1 %v266_v32  ;;  %833 = vmatpush3.msra.mxu0 %v460_v38 }
  0x21   :  { %797 = vmatpush3.msra.mxu1 %v266_v32  ;;  %834 = vmatprep.subr.mxu0 %v459_v39  ;;  %v451_v32 = vld [vmem:[%s1162_s5 + $0x10] sm:$0xff] }
  0x22   :  { %766 = vmatmul.mubr.msk.f32.gmra.mxu0 %vm51_vm1, %v41_v29  ;;  %798 = vmatprep.subr.mxu1 %v265_v33 }
  0x23   :  { %799 = vmatpush3.msra.mxu1 %v265_v33  ;;  %835 = vmatpush3.msra.mxu0 %v459_v39  ;;  %v450_v33 = vld [vmem:[%s1162_s5 + $0x8] sm:$0xff] }
  0x24   :  { %836 = vmatprep.subr.mxu0 %v458_v40 }
  0x25   :  { %837 = vmatpush3.msra.mxu0 %v458_v40 }
  0x26   :  { %838 = vmatprep.subr.mxu0 %v457_v41 }
  0x27   :  { %839 = vmatpush3.msra.mxu0 %v457_v41 }
  0x28   :  { %840 = vmatprep.subr.mxu0 %v456_v42 }
  0x29   :  { %841 = vmatpush3.msra.mxu0 %v456_v42 }
  0x2a   :  { %842 = vmatprep.subr.mxu0 %v455_v43 }
  0x2b   :  { %843 = vmatpush3.msra.mxu0 %v455_v43 }
  0x2c   :  { %844 = vmatprep.subr.mxu0 %v454_v44 }
  0x2d   :  { %845 = vmatpush3.msra.mxu0 %v454_v44 }
  0x2e   :  { %846 = vmatprep.subr.mxu0 %v453_v45 }
  0x2f   :  { %847 = vmatpush3.msra.mxu0 %v453_v45 }
  0x30   :  { %848 = vmatprep.subr.mxu0 %v452_v46 }
  0x31   :  { %849 = vmatpush3.msra.mxu0 %v452_v46 }
  0x32   :  { %850 = vmatprep.subr.mxu0 %v451_v32 }
  0x33   :  { %851 = vmatpush3.msra.mxu0 %v451_v32 }
  0x34   :  { %852 = vmatprep.subr.mxu0 %v450_v33 }
  0x35   :  { %853 = vmatpush3.msra.mxu0 %v450_v33 }
  0x36   :  { %854 = vmatprep.subr.mxu0 %v449_v34 }
  0x37   :  { %855 = vmatpush3.msra.mxu0 %v449_v34 }
  0xc6   :  { %v746_v48 = vpop.f32.mrf.mxu0 }
  0xc7   :  { %v176_v49 = vadd.f32 %v746_v48, %v638_v47 }
  0xc8   :  { %v170_v50 = vpop.f32.mrf.mxu0 }
  0xc9   :  { %v171_v51 = vadd.f32 %v638_v47, %v170_v50  ;;  %v250_v54 = vmax.f32 %v176_v49, 0.0 }
  0xca   :  { %v749_v52 = vpop.f32.mrf.mxu0 }
  0xcb   :  { %v249_v53 = vmax.f32 %v171_v51, 0.0  ;;  %v186_v55 = vadd.f32 %v749_v52, %v638_v47 }
  0xcc   :  { %v180_v56 = vpop.f32.mrf.mxu0 }
  0xcd   :  { %v181_v57 = vadd.f32 %v638_v47, %v180_v56  ;;  %800 = vmatprep.mubr.f32.mxu1 %v249_v53  ;;  %v252_v60 = vmax.f32 %v186_v55, 0.0 }
  0xce   :  { %v752_v58 = vpop.f32.mrf.mxu0  ;;  %801 = vmatmul.mubr.f32.vlgmr.msra.gmra.mxu1 %v250_v54 }
  0xcf   :  { %v251_v59 = vmax.f32 %v181_v57, 0.0  ;;  %v196_v61 = vadd.f32 %v752_v58, %v638_v47 }
  0xd0   :  { %v190_v62 = vpop.f32.mrf.mxu0 }
  0xd1   :  { %v191_v63 = vadd.f32 %v638_v47, %v190_v62  ;;  %803 = vmatprep.mubr.f32.mxu1 %v251_v59  ;;  %v254_v2 = vmax.f32 %v196_v61, 0.0 }
  0xd2   :  { %v755_v0 = vpop.f32.mrf.mxu0  ;;  %804 = vmatmul.mubr.f32.gmra.mxu1 %v252_v60 }
  0xd3   :  { %v253_v1 = vmax.f32 %v191_v63, 0.0  ;;  %v206_v3 = vadd.f32 %v755_v0, %v638_v47 }
  0xd4   :  { %v200_v4 = vpop.f32.mrf.mxu0 }
  0xd5   :  { %v201_v5 = vadd.f32 %v638_v47, %v200_v4  ;;  %806 = vmatprep.mubr.f32.mxu1 %v253_v1  ;;  %v256_v8 = vmax.f32 %v206_v3, 0.0 }
  0xd6   :  { %v758_v6 = vpop.f32.mrf.mxu0  ;;  %807 = vmatmul.mubr.f32.gmra.mxu1 %v254_v2 }
  0xd7   :  { %v255_v7 = vmax.f32 %v201_v5, 0.0  ;;  %v216_v9 = vadd.f32 %v758_v6, %v638_v47 }
  0xd8   :  { %v210_v10 = vpop.f32.mrf.mxu0 }
  0xd9   :  { %v211_v11 = vadd.f32 %v638_v47, %v210_v10  ;;  %809 = vmatprep.mubr.f32.mxu1 %v255_v7  ;;  %v258_v14 = vmax.f32 %v216_v9, 0.0 }
  0xda   :  { %v761_v12 = vpop.f32.mrf.mxu0  ;;  %810 = vmatmul.mubr.f32.gmra.mxu1 %v256_v8 }
  0xdb   :  { %v257_v13 = vmax.f32 %v211_v11, 0.0  ;;  %v226_v15 = vadd.f32 %v761_v12, %v638_v47 }
  0xdc   :  { %v220_v16 = vpop.f32.mrf.mxu0 }
  0xdd   :  { %v221_v17 = vadd.f32 %v638_v47, %v220_v16  ;;  %812 = vmatprep.mubr.f32.mxu1 %v257_v13  ;;  %v260_v20 = vmax.f32 %v226_v15, 0.0 }
  0xde   :  { %v764_v18 = vpop.f32.mrf.mxu0  ;;  %813 = vmatmul.mubr.f32.gmra.mxu1 %v258_v14 }
  0xdf   :  { %v259_v19 = vmax.f32 %v221_v17, 0.0  ;;  %v236_v21 = vadd.f32 %v764_v18, %v638_v47 }
  0xe0   :  { %v230_v22 = vpop.f32.mrf.mxu0 }
  0xe1   :  { %v231_v23 = vadd.f32 %v638_v47, %v230_v22  ;;  %815 = vmatprep.mubr.f32.mxu1 %v259_v19  ;;  %v262_v26 = vmax.f32 %v236_v21, 0.0 }
  0xe2   :  { %v767_v24 = vpop.f32.mrf.mxu0  ;;  %816 = vmatmul.mubr.f32.gmra.mxu1 %v260_v20  ;;  %v657_v20 = vld [vmem:[%s1165_s6] ss:$0 sm:$0xff] }
  0xe3   :  { %v261_v25 = vmax.f32 %v231_v23, 0.0  ;;  %v246_v27 = vadd.f32 %v767_v24, %v638_v47 }
  0xe4   :  { %v240_v28 = vpop.f32.mrf.mxu0 }
  0xe5   :  { %v241_v29 = vadd.f32 %v638_v47, %v240_v28  ;;  %818 = vmatprep.mubr.f32.mxu1 %v261_v25  ;;  %v264_v31 = vmax.f32 %v246_v27, 0.0 }
  0xe6   :  { %819 = vmatmul.mubr.f32.gmra.mxu1 %v262_v26 }
  0xe7   :  { %v263_v30 = vmax.f32 %v241_v29, 0.0 }
  0xe9   :  { %821 = vmatprep.mubr.f32.mxu1 %v263_v30 }
  0xea   :  { %822 = vmatmul.mubr.f32.gmra.mxu1 %v264_v31 }
 0x18e   :  { %v802_v36 = vpop.f32.mrf.mxu1 }
 0x18f   :  { %v360_v37 = vadd.f32 %v802_v36, %v656_v35 }
 0x190   :  { %v354_v38 = vpop.f32.mrf.mxu1 }
 0x191   :  { %v355_v39 = vadd.f32 %v656_v35, %v354_v38  ;;  %v434_v42 = vmax.f32 %v360_v37, 0.0 }
 0x192   :  { %v805_v40 = vpop.f32.mrf.mxu1 }
 0x193   :  { %v433_v41 = vmax.f32 %v355_v39, 0.0  ;;  %v370_v43 = vadd.f32 %v805_v40, %v656_v35 }
 0x194   :  { %v364_v44 = vpop.f32.mrf.mxu1 }
 0x195   :  { %v365_v45 = vadd.f32 %v656_v35, %v364_v44  ;;  %856 = vmatprep.mubr.f32.mxu0 %v433_v41  ;;  %v436_v48 = vmax.f32 %v370_v43, 0.0 }
 0x196   :  { %v808_v46 = vpop.f32.mrf.mxu1  ;;  %857 = vmatmul.mubr.f32.vlgmr.msra.gmra.mxu0 %v434_v42 }
 0x197   :  { %v435_v47 = vmax.f32 %v365_v45, 0.0  ;;  %v380_v49 = vadd.f32 %v808_v46, %v656_v35 }
 0x198   :  { %v374_v50 = vpop.f32.mrf.mxu1 }
 0x199   :  { %v375_v51 = vadd.f32 %v656_v35, %v374_v50  ;;  %859 = vmatprep.mubr.f32.mxu0 %v435_v47  ;;  %v438_v54 = vmax.f32 %v380_v49, 0.0 }
 0x19a   :  { %v811_v52 = vpop.f32.mrf.mxu1  ;;  %860 = vmatmul.mubr.f32.gmra.mxu0 %v436_v48 }
 0x19b   :  { %v437_v53 = vmax.f32 %v375_v51, 0.0  ;;  %v390_v55 = vadd.f32 %v811_v52, %v656_v35 }
 0x19c   :  { %v384_v56 = vpop.f32.mrf.mxu1 }
 0x19d   :  { %v385_v57 = vadd.f32 %v656_v35, %v384_v56  ;;  %862 = vmatprep.mubr.f32.mxu0 %v437_v53  ;;  %v440_v60 = vmax.f32 %v390_v55, 0.0 }
 0x19e   :  { %v814_v58 = vpop.f32.mrf.mxu1  ;;  %863 = vmatmul.mubr.f32.gmra.mxu0 %v438_v54 }
 0x19f   :  { %v439_v59 = vmax.f32 %v385_v57, 0.0  ;;  %v400_v61 = vadd.f32 %v814_v58, %v656_v35 }
 0x1a0   :  { %v394_v62 = vpop.f32.mrf.mxu1 }
 0x1a1   :  { %v395_v63 = vadd.f32 %v656_v35, %v394_v62  ;;  %865 = vmatprep.mubr.f32.mxu0 %v439_v59  ;;  %v442_v2 = vmax.f32 %v400_v61, 0.0 }
 0x1a2   :  { %v817_v0 = vpop.f32.mrf.mxu1  ;;  %866 = vmatmul.mubr.f32.gmra.mxu0 %v440_v60 }
 0x1a3   :  { %v441_v1 = vmax.f32 %v395_v63, 0.0  ;;  %v410_v3 = vadd.f32 %v817_v0, %v656_v35 }
 0x1a4   :  { %v404_v4 = vpop.f32.mrf.mxu1 }
 0x1a5   :  { %v405_v5 = vadd.f32 %v656_v35, %v404_v4  ;;  %868 = vmatprep.mubr.f32.mxu0 %v441_v1  ;;  %v444_v8 = vmax.f32 %v410_v3, 0.0 }
 0x1a6   :  { %v820_v6 = vpop.f32.mrf.mxu1  ;;  %869 = vmatmul.mubr.f32.gmra.mxu0 %v442_v2 }
 0x1a7   :  { %v443_v7 = vmax.f32 %v405_v5, 0.0  ;;  %v420_v9 = vadd.f32 %v820_v6, %v656_v35 }
 0x1a8   :  { %v414_v10 = vpop.f32.mrf.mxu1 }
 0x1a9   :  { %v415_v11 = vadd.f32 %v656_v35, %v414_v10  ;;  %871 = vmatprep.mubr.f32.mxu0 %v443_v7  ;;  %v446_v14 = vmax.f32 %v420_v9, 0.0 }
 0x1aa   :  { %v823_v12 = vpop.f32.mrf.mxu1  ;;  %872 = vmatmul.mubr.f32.gmra.mxu0 %v444_v8 }
 0x1ab   :  { %v445_v13 = vmax.f32 %v415_v11, 0.0  ;;  %v430_v15 = vadd.f32 %v823_v12, %v656_v35 }
 0x1ac   :  { %v424_v16 = vpop.f32.mrf.mxu1 }
 0x1ad   :  { %v425_v17 = vadd.f32 %v656_v35, %v424_v16  ;;  %874 = vmatprep.mubr.f32.mxu0 %v445_v13  ;;  %v448_v19 = vmax.f32 %v430_v15, 0.0 }
 0x1ae   :  { %875 = vmatmul.mubr.f32.gmra.mxu0 %v446_v14 }
 0x1af   :  { %v447_v18 = vmax.f32 %v425_v17, 0.0 }
 0x1b1   :  { %877 = vmatprep.mubr.f32.mxu0 %v447_v18 }
 0x1b2   :  { %878 = vmatmul.mubr.f32.gmra.mxu0 %v448_v19 }
 0x256   :  { %v858_v21 = vpop.f32.mrf.mxu0 }
 0x257   :  { %v544_v22 = vadd.f32 %v858_v21, %v657_v20 }
 0x258   :  { %v538_v23 = vpop.f32.mrf.mxu0 }
 0x259   :  { %619 = vst.msk [vmem:[%s1166_s7 + $0x8] sm:$0xff] %vm617_vm2, %v544_v22  ;;  %v539_v24 = vadd.f32 %v657_v20, %v538_v23 }
 0x25a   :  { %v861_v25 = vpop.f32.mrf.mxu0 }
 0x25b   :  { %618 = vst.msk [vmem:[%s1166_s7] sm:$0xff] %vm617_vm2, %v539_v24  ;;  %v554_v26 = vadd.f32 %v861_v25, %v657_v20 }
 0x25c   :  { %v548_v27 = vpop.f32.mrf.mxu0 }
 0x25d   :  { %621 = vst.msk [vmem:[%s1166_s7 + $0x18] sm:$0xff] %vm617_vm2, %v554_v26  ;;  %v549_v28 = vadd.f32 %v657_v20, %v548_v27 }
 0x25e   :  { %v864_v29 = vpop.f32.mrf.mxu0 }
 0x25f   :  { %620 = vst.msk [vmem:[%s1166_s7 + $0x10] sm:$0xff] %vm617_vm2, %v549_v28  ;;  %v564_v30 = vadd.f32 %v864_v29, %v657_v20 }
 0x260   :  { %v558_v31 = vpop.f32.mrf.mxu0 }
 0x261   :  { %623 = vst.msk [vmem:[%s1166_s7 + $0x28] sm:$0xff] %vm617_vm2, %v564_v30  ;;  %v559_v32 = vadd.f32 %v657_v20, %v558_v31 }
 0x262   :  { %v867_v33 = vpop.f32.mrf.mxu0 }
 0x263   :  { %622 = vst.msk [vmem:[%s1166_s7 + $0x20] sm:$0xff] %vm617_vm2, %v559_v32  ;;  %v574_v34 = vadd.f32 %v867_v33, %v657_v20 }
 0x264   :  { %v568_v35 = vpop.f32.mrf.mxu0 }
 0x265   :  { %625 = vst.msk [vmem:[%s1166_s7 + $0x38] sm:$0xff] %vm617_vm2, %v574_v34  ;;  %v569_v36 = vadd.f32 %v657_v20, %v568_v35 }
 0x266   :  { %v870_v37 = vpop.f32.mrf.mxu0 }
 0x267   :  { %624 = vst.msk [vmem:[%s1166_s7 + $0x30] sm:$0xff] %vm617_vm2, %v569_v36  ;;  %v584_v38 = vadd.f32 %v870_v37, %v657_v20 }
 0x268   :  { %v578_v39 = vpop.f32.mrf.mxu0 }
 0x269   :  { %627 = vst.msk [vmem:[%s1166_s7 + $0x48] sm:$0xff] %vm617_vm2, %v584_v38  ;;  %v579_v40 = vadd.f32 %v657_v20, %v578_v39 }
 0x26a   :  { %v873_v41 = vpop.f32.mrf.mxu0 }
 0x26b   :  { %626 = vst.msk [vmem:[%s1166_s7 + $0x40] sm:$0xff] %vm617_vm2, %v579_v40  ;;  %v594_v42 = vadd.f32 %v873_v41, %v657_v20 }
 0x26c   :  { %v588_v43 = vpop.f32.mrf.mxu0 }
 0x26d   :  { %629 = vst.msk [vmem:[%s1166_s7 + $0x58] sm:$0xff] %vm617_vm2, %v594_v42  ;;  %v589_v44 = vadd.f32 %v657_v20, %v588_v43 }
 0x26e   :  { %v876_v45 = vpop.f32.mrf.mxu0 }
 0x26f   :  { %628 = vst.msk [vmem:[%s1166_s7 + $0x50] sm:$0xff] %vm617_vm2, %v589_v44  ;;  %v604_v46 = vadd.f32 %v876_v45, %v657_v20 }
 0x270   :  { %v598_v47 = vpop.f32.mrf.mxu0 }
 0x271   :  { %631 = vst.msk [vmem:[%s1166_s7 + $0x68] sm:$0xff] %vm617_vm2, %v604_v46  ;;  %v599_v48 = vadd.f32 %v657_v20, %v598_v47 }
 0x272   :  { %v879_v49 = vpop.f32.mrf.mxu0 }
 0x273   :  { %630 = vst.msk [vmem:[%s1166_s7 + $0x60] sm:$0xff] %vm617_vm2, %v599_v48  ;;  %v614_v50 = vadd.f32 %v879_v49, %v657_v20 }
 0x274   :  { %v608_v51 = vpop.f32.mrf.mxu0 }
 0x275   :  { %633 = vst.msk [vmem:[%s1166_s7 + $0x78] sm:$0xff] %vm617_vm2, %v614_v50  ;;  %v609_v52 = vadd.f32 %v657_v20, %v608_v51 }
 0x277   :  { %632 = vst.msk [vmem:[%s1166_s7 + $0x70] sm:$0xff] %vm617_vm2, %v609_v52 }

</bundles_post_ra>
